<compile_context>
chip_gen: v5e
topology: v5e:2x2
jax: 0.10.0
libtpu: 0.0.40
codegen_flags: <defaults>
</compile_context>

<pallas_src>
import functools

import jax
import jax.numpy as jnp
from jax import lax
from jax.experimental import pallas as pl
from jax.experimental.pallas import tpu as pltpu

_EPS = 1e-6  # F.pairwise_distance default eps


def _contrastive_loss_kernel(x1_ref, x2_ref, label_ref, out_ref, acc_ref, *,
                             margin, total_b, tile_b, needs_mask):
    i = pl.program_id(0)

    @pl.when(i == 0)
    def _init():
        acc_ref[0, 0] = jnp.float32(0.0)

    # Cast inside the kernel (inputs may be bf16); all math in f32.
    x1 = x1_ref[...].astype(jnp.float32)
    x2 = x2_ref[...].astype(jnp.float32)
    diff = x1 - x2 + jnp.float32(_EPS)                       # (TB, D)
    sq = jnp.sum(diff * diff, axis=-1, keepdims=True)        # (TB, 1)
    d = jnp.sqrt(sq)                                         # euclidean distance

    lbl = label_ref[...].astype(jnp.float32)                 # (TB, 1)
    hinge = jnp.maximum(jnp.float32(margin) - d, 0.0)
    # Reuse sq (== d^2) instead of recomputing d * d.
    per_example = (1.0 - lbl) * sq + lbl * (hinge * hinge)   # (TB, 1)

    if needs_mask:
        # Mask rows past the true batch size in the (padded) trailing tile.
        row = i * tile_b + lax.broadcasted_iota(jnp.int32, (tile_b, 1), 0)
        per_example = jnp.where(row < total_b, per_example, 0.0)

    acc_ref[0, 0] += jnp.sum(per_example)

    @pl.when(i == pl.num_programs(0) - 1)
    def _finalize():
        out_ref[0, 0] = acc_ref[0, 0] / jnp.float32(total_b)


def _pick_block_rows(batch, feat, itemsize):
    """Rows per tile so 2 inputs x 2 pipeline buffers stay under ~16 MiB."""
    budget = 16 * 1024 * 1024
    per_row = 2 * 2 * max(feat, 1) * itemsize
    tb = budget // per_row
    tb = min(max(tb, 8), 2048)
    tb = (tb // 8) * 8  # (8, 128) sublane constraint on the block's 2nd-last dim
    return tb


def contrastive_loss(output1, output2, label, margin=2.0, block_rows=None):
    """output1, output2: [B, D] float (f32 or bf16); label: [B] (0 or 1)."""
    B, D = output1.shape
    label2d = label.reshape(B, 1)

    itemsize = jnp.dtype(output1.dtype).itemsize
    tb = int(block_rows) if block_rows is not None else _pick_block_rows(B, D, itemsize)
    if tb >= B:
        tb = B                      # single tile: block == full batch (always legal)
    else:
        tb = max(8, (tb // 8) * 8)  # multiple of 8 to satisfy sublane tiling

    num_tiles = pl.cdiv(B, tb)
    needs_mask = (num_tiles * tb) != B

    kernel = functools.partial(
        _contrastive_loss_kernel,
        margin=float(margin), total_b=B, tile_b=tb, needs_mask=needs_mask)

    bytes_accessed = int(2 * B * D * itemsize
                         + B * jnp.dtype(label2d.dtype).itemsize + 4)
    cost = pl.CostEstimate(
        flops=int(3 * B * D + 8 * B),
        transcendentals=int(B),                 # one sqrt per example
        bytes_accessed=bytes_accessed)

    out = pl.pallas_call(
        kernel,
        out_shape=jax.ShapeDtypeStruct((1, 1), jnp.float32),
        grid=(num_tiles,),
        in_specs=[
            pl.BlockSpec((tb, D), lambda i: (i, 0)),
            pl.BlockSpec((tb, D), lambda i: (i, 0)),
            pl.BlockSpec((tb, 1), lambda i: (i, 0)),
        ],
        # Scalar result lives in SMEM (no lane-sparse VMEM store / output DMA).
        out_specs=pl.BlockSpec(memory_space=pltpu.MemorySpace.SMEM),
        scratch_shapes=[pltpu.SMEM((1, 1), jnp.float32)],
        compiler_params=pltpu.CompilerParams(
            # Batch axis carries the accumulator -> reduction axis.
            dimension_semantics=("arbitrary",)),
        cost_estimate=cost,
    )(output1, output2, label2d)
    return out[0, 0]


def _reference(output1, output2, label, margin=2.0):
    d = jnp.sqrt(jnp.sum((output1 - output2 + _EPS) ** 2, axis=-1))
    return jnp.mean(
        (1.0 - label) * d**2 + label * jnp.maximum(margin - d, 0.0) ** 2
    )


if __name__ == "__main__":
    key = jax.random.PRNGKey(0)
    k1, k2, k3, k4, k5, k6 = jax.random.split(key, 6)

    # Case 1: small f32 problem, single tile; distances < margin so the hinge
    # branch is exercised.
    B, D = 8, 32
    o1 = jax.random.normal(k1, (B, D), dtype=jnp.float32)
    o2 = o1 + 0.05 * jax.random.normal(k2, (B, D), dtype=jnp.float32)
    lbl = jax.random.bernoulli(k3, 0.5, (B,)).astype(jnp.float32)

    loss = jax.block_until_ready(contrastive_loss(o1, o2, lbl, margin=2.0))
    ref = _reference(o1, o2, lbl, margin=2.0)
    assert jnp.allclose(loss, ref, rtol=1e-5, atol=1e-5), (loss, ref)

    # Case 2: bf16 inputs, batch not divisible by the tile -> exercises the
    # multi-tile accumulator, in-kernel cast, and padded-row masking.
    B2, D2 = 37, 160
    o1b = jax.random.normal(k4, (B2, D2), dtype=jnp.bfloat16)
    o2b = jax.random.normal(k5, (B2, D2), dtype=jnp.bfloat16)
    lblb = jax.random.bernoulli(k6, 0.5, (B2,)).astype(jnp.float32)

    loss2 = jax.block_until_ready(
        contrastive_loss(o1b, o2b, lblb, margin=2.0, block_rows=16))
    ref2 = _reference(o1b.astype(jnp.float32), o2b.astype(jnp.float32),
                      lblb, margin=2.0)
    assert jnp.allclose(loss2, ref2, rtol=1e-4, atol=1e-4), (loss2, ref2)

    print("KERNEL_OK")
</pallas_src>

<mosaic_0001>
module attributes {stable_mosaic.version = 11 : i64} {
  func.func @_contrastive_loss_kernel(%arg0: i32, %arg1: memref<8x32xf32, #tpu.memory_space<vmem>>, %arg2: memref<8x32xf32, #tpu.memory_space<vmem>>, %arg3: memref<8x1xf32, #tpu.memory_space<vmem>>, %arg4: memref<1x1xf32, #tpu.memory_space<smem>>, %arg5: memref<1x1xf32, #tpu.memory_space<smem>>) attributes {dimension_semantics = [#tpu.dimension_semantics<arbitrary>], iteration_bounds = array<i64: 1>, scalar_prefetch = 0 : i64, scratch_operands = 1 : i64, tpu.core_type = #tpu.core_type<tc>, window_params = [{transform_indices = @transform_0, window_bounds = array<i64: 8, 32>}, {transform_indices = @transform_1, window_bounds = array<i64: 8, 32>}, {transform_indices = @transform_2, window_bounds = array<i64: 8, 1>}, {transform_indices = @transform_3, window_bounds = array<i64: 1, 1>}]} {
    %c0_i32 = arith.constant 0 : i32
    %0 = arith.cmpi eq, %arg0, %c0_i32 : i32
    %1 = arith.extui %0 : i1 to i32
    %c0_i32_0 = arith.constant 0 : i32
    %2 = arith.cmpi ne, %1, %c0_i32_0 : i32
    scf.if %2 {
      %cst_17 = arith.constant 0.000000e+00 : f32
      %c0_18 = arith.constant 0 : index
      %c0_19 = arith.constant 0 : index
      %33 = memref.load %arg5[%c0_18, %c0_19] : memref<1x1xf32, #tpu.memory_space<smem>>
      memref.store %cst_17, %arg5[%c0_18, %c0_19] : memref<1x1xf32, #tpu.memory_space<smem>>
    } else {
    }
    %c0 = arith.constant 0 : index
    %c0_1 = arith.constant 0 : index
    %3 = vector.load %arg1[%c0, %c0_1] : memref<8x32xf32, #tpu.memory_space<vmem>>, vector<8x32xf32>
    %c0_2 = arith.constant 0 : index
    %c0_3 = arith.constant 0 : index
    %4 = vector.load %arg2[%c0_2, %c0_3] : memref<8x32xf32, #tpu.memory_space<vmem>>, vector<8x32xf32>
    %5 = arith.subf %3, %4 : vector<8x32xf32>
    %cst = arith.constant 9.99999997E-7 : f32
    %6 = vector.broadcast %cst : f32 to vector<8x32xf32>
    %7 = arith.addf %5, %6 : vector<8x32xf32>
    %8 = arith.mulf %7, %7 : vector<8x32xf32>
    %cst_4 = arith.constant dense<0.000000e+00> : vector<8xf32>
    %9 = vector.multi_reduction <add>, %8, %cst_4 [1] : vector<8x32xf32> to vector<8xf32>
    %10 = vector.shape_cast %9 : vector<8xf32> to vector<8x1xf32>
    %11 = math.sqrt %10 : vector<8x1xf32>
    %c0_5 = arith.constant 0 : index
    %c0_6 = arith.constant 0 : index
    %12 = vector.load %arg3[%c0_5, %c0_6] : memref<8x1xf32, #tpu.memory_space<vmem>>, vector<8x1xf32>
    %cst_7 = arith.constant 2.000000e+00 : f32
    %13 = vector.broadcast %cst_7 : f32 to vector<8x1xf32>
    %14 = arith.subf %13, %11 : vector<8x1xf32>
    %cst_8 = arith.constant 0.000000e+00 : f32
    %15 = vector.broadcast %cst_8 : f32 to vector<8x1xf32>
    %16 = arith.maximumf %14, %15 : vector<8x1xf32>
    %cst_9 = arith.constant 1.000000e+00 : f32
    %17 = vector.broadcast %cst_9 : f32 to vector<8x1xf32>
    %18 = arith.subf %17, %12 : vector<8x1xf32>
    %19 = arith.mulf %18, %10 : vector<8x1xf32>
    %20 = arith.mulf %16, %16 : vector<8x1xf32>
    %21 = arith.mulf %12, %20 : vector<8x1xf32>
    %22 = arith.addf %19, %21 : vector<8x1xf32>
    %c0_10 = arith.constant 0 : index
    %c0_11 = arith.constant 0 : index
    %23 = memref.load %arg5[%c0_10, %c0_11] : memref<1x1xf32, #tpu.memory_space<smem>>
    %24 = vector.shape_cast %22 : vector<8x1xf32> to vector<1x8x1xf32>
    %cst_12 = arith.constant dense<0.000000e+00> : vector<1xf32>
    %25 = vector.multi_reduction <add>, %24, %cst_12 [1, 2] : vector<1x8x1xf32> to vector<1xf32>
    %26 = vector.shape_cast %25 : vector<1xf32> to vector<1x1x1xf32>
    %27 = vector.extract %26[0, 0, 0] : f32 from vector<1x1x1xf32>
    %28 = arith.addf %23, %27 : f32
    %c0_13 = arith.constant 0 : index
    %c0_14 = arith.constant 0 : index
    %29 = memref.load %arg5[%c0_13, %c0_14] : memref<1x1xf32, #tpu.memory_space<smem>>
    memref.store %28, %arg5[%c0_13, %c0_14] : memref<1x1xf32, #tpu.memory_space<smem>>
    %c0_i32_15 = arith.constant 0 : i32
    %30 = arith.cmpi eq, %arg0, %c0_i32_15 : i32
    %31 = arith.extui %30 : i1 to i32
    %c0_i32_16 = arith.constant 0 : i32
    %32 = arith.cmpi ne, %31, %c0_i32_16 : i32
    scf.if %32 {
      %c0_17 = arith.constant 0 : index
      %c0_18 = arith.constant 0 : index
      %33 = memref.load %arg5[%c0_17, %c0_18] : memref<1x1xf32, #tpu.memory_space<smem>>
      %cst_19 = arith.constant 8.000000e+00 : f32
      %34 = arith.divf %33, %cst_19 : f32
      %c0_20 = arith.constant 0 : index
      %c0_21 = arith.constant 0 : index
      %35 = memref.load %arg4[%c0_20, %c0_21] : memref<1x1xf32, #tpu.memory_space<smem>>
      memref.store %34, %arg4[%c0_20, %c0_21] : memref<1x1xf32, #tpu.memory_space<smem>>
    } else {
    }
    return
  }
  func.func @transform_0(%arg0: i32) -> (i32, i32) {
    %c0_i32 = arith.constant 0 : i32
    %c0_i32_0 = arith.constant 0 : i32
    return %arg0, %c0_i32 : i32, i32
  }
  func.func @transform_1(%arg0: i32) -> (i32, i32) {
    %c0_i32 = arith.constant 0 : i32
    %c0_i32_0 = arith.constant 0 : i32
    return %arg0, %c0_i32 : i32, i32
  }
  func.func @transform_2(%arg0: i32) -> (i32, i32) {
    %c0_i32 = arith.constant 0 : i32
    %c0_i32_0 = arith.constant 0 : i32
    return %arg0, %c0_i32 : i32, i32
  }
  func.func @transform_3(%arg0: i32) -> (i32, i32) {
    %c0_i32 = arith.constant 0 : i32
    %c0_i32_0 = arith.constant 0 : i32
    %c0_i32_1 = arith.constant 0 : i32
    return %c0_i32, %c0_i32_0 : i32, i32
  }
}

</mosaic_0001>

<bundles_post_ra>
// kernel: tpu_custom_call.1
= control target key start
LH: loop header
LB: loop body
LE: loop exit
PB: predicated region body
PF: predicated region fallthrough
CT: control target
= control target key end

     0   :  { %8 = vsyncpa [#allocation4], 0  ;;  %s196_s0 = inlined_call_operand.vmem [shape: f32[8,32], index: 0, kind: input, shape index: {}]   ;;  %s197_s1 = inlined_call_operand.hbm [shape: f32[8,32], index: 1, kind: input, shape index: {}]   ;;  %s198_s2 = inlined_call_operand.vmem [shape: f32[8,1], index: 2, kind: input, shape index: {}]   ;;  %s199_s3 = inlined_call_operand.hbm [shape: f32[1,1], index: 3, kind: output, shape index: {}]  }
   0x1   :  { %9 = vsyncpa [#allocation5], 0  ;;  %s17_s14 = sshll.u32 %s197_s1, 4  ;;  %s161_s15 = smov [#allocation3]   ;;  %s18_s14 = int_to_ptr.hbm [resolvable:$true] %s17_s14 }
   0x2   :  { %s19_s16 = sshll.u32 %s161_s15, 4  ;;  %s20_s16 = int_to_ptr.vmem [resolvable:$true] %s19_s16 }
   0x3   :  { %22 = dma.hbm_to_vmem [thread:$0]  %s18_s14, 128, %s20_s16, [#allocation4]  }
   0x4   :  { %157 = dma.done.wait [#allocation4], 128  }
   0x5   :  { %158 = vsyncadd [#allocation4], 4294967168  ;;  %v35_v0 = vld [vmem:[%s196_s0] sm:$0xff]  ;;  %vm40_vm0 = vcmask 261120   ;;  %vm65_vm3 = vcmask 7168   ;;  %v162_v26 = vmov 8.0  }
   0x6   :  { %v36_v1 = vld [vmem:[#allocation3] sm:$0xff]  ;;  %s99_s20 = sshll.u32 %s199_s3, 4  ;;  %s163_s24 = smov [#allocation6]   ;;  %s100_s20 = int_to_ptr.hbm [resolvable:$true] %s99_s20 }
   0x7   :  { %v37_v2 = vsub.f32 %v35_v0, %v36_v1  ;;  %v56_v17 = vld [vmem:[%s198_s2] sm:$0xff] }
   0x8   :  { %v59_v20 = vsub.f32 1.0, %v56_v17 }
   0x9   :  { %v38_v3 = vadd.f32 1e-06, %v37_v2 }
   0xb   :  { %v39_v4 = vmul.f32 %v38_v3, %v38_v3 }
   0xd   :  { %v41_v5 = vsel %vm40_vm0, %v39_v4, 0.0 }
   0xe   :  { %42 = vadd.xlane.f32.xlu0 %v41_v5 }
  0x81   :  { %v43_v6 = vpop.xlane.xlu0 %42 }
  0x82   :  { %117 = vrsqrt.f32 %v43_v6  ;;  %vm51_vm1 = vcmp.eq.f32.partialorder %v43_v6, inf  ;;  %v54_v14 = vand.u32 2147483648, %v43_v6  ;;  %vm53_vm2 = vcmp.eq.f32.partialorder %v43_v6, 0.0 }
  0x83   :  { %v60_v22 = vmul.f32 %v59_v20, %v43_v6  ;;  %119 = vrcp.f32 %v162_v26 }
  0x88   :  { %v118_v7 = vpop.eup %117 }
  0x89   :  { %v45_v8 = vmul.f32 %v118_v7, %v43_v6  ;;  %v120_v27 = vpop.eup %119 }
  0x8a   :  { %v84_v28 = vmul.f32 8.0, %v120_v27  ;;  %vm88_vm4 = vweird.f32 %v120_v27 }
  0x8b   :  { %v46_v9 = vmul.f32 %v118_v7, %v45_v8 }
  0x8c   :  { %v85_v29 = vsub.f32 1.0, %v84_v28 }
  0x8d   :  { %v47_v10 = vmul.f32 0.5, %v46_v9 }
  0x8e   :  { %v86_v33 = vmul.f32 %v120_v27, %v85_v29 }
  0x8f   :  { %v48_v11 = vsub.f32 1.5, %v47_v10 }
  0x90   :  { %v87_v36 = vadd.f32 %v120_v27, %v86_v33 }
  0x91   :  { %v49_v12 = vmul.f32 %v118_v7, %v48_v11 }
  0x92   :  { %v89_v39 = vsel %vm88_vm4, %v120_v27, %v87_v36 }
  0x93   :  { %v50_v13 = vmul.f32 %v49_v12, %v43_v6 }
  0x95   :  { %v52_v15 = vsel %vm51_vm1, %v43_v6, %v50_v13 }
  0x96   :  { %v55_v16 = vsel %vm53_vm2, %v54_v14, %v52_v15 }
  0x97   :  { %v57_v18 = vsub.f32 2.0, %v55_v16 }
  0x99   :  { %v58_v19 = vmax.f32 %v57_v18, 0.0 }
  0x9b   :  { %v61_v21 = vmul.f32 %v58_v19, %v58_v19 }
  0x9d   :  { %v62_v23 = vmul.f32 %v61_v21, %v56_v17 }
  0x9f   :  { %v63_v24 = vadd.f32 %v62_v23, %v60_v22 }
  0xa1   :  { %v66_v25 = vsel %vm65_vm3, %v63_v24, 0.0 }
  0xa2   :  { %67 = vadd.xlane.f32.xlu0 %v66_v25 }
 0x115   :  { %v68_v30 = vpop.xlane.xlu0 %67 }
 0x116   :  { %v69_v31 = vrot.slane %v68_v30, 4 }
 0x118   :  { %v70_v32 = vadd.f32 %v69_v31, %v68_v30 }
 0x11a   :  { %v71_v34 = vrot.slane %v70_v32, 2 }
 0x11c   :  { %v72_v35 = vadd.f32 %v71_v34, %v70_v32 }
 0x11e   :  { %v73_v37 = vrot.slane %v72_v35, 1 }
 0x120   :  { %v74_v38 = vadd.f32 %v73_v37, %v72_v35 }
 0x122   :  { %110 = vpush %v74_v38 }
 0x123   :  { %112 = vpush %v89_v39 }
 0x153   :  { %s111_s21 = spop %110 }
 0x154   :  { %s113_s22 = spop %112 }
 0x155   :  { %s91_s23 = smul.f32 %s113_s22, %s111_s21 }
 0x157   :  { %93 = sst [smem:[#allocation6]] %s91_s23 }
 0x158   :  { %102 = dma.smem_to_hbm %s163_s24, 16, %s100_s20, [#allocation5]  }
 0x159   :  { %159 = dma.done.wait [#allocation5], 16  }
 0x15a   :  { %160 = vsyncadd [#allocation5], 4294967280 }
 0x15b   :  { %107 = sfence }
 0x15c   :  { %108 = vsyncpa [#allocation4], 1 }
 0x15d   :  { %109 = vsyncpa [#allocation5], 1 }

</bundles_post_ra>
